<compile_context>
chip_gen: v6e
topology: v6e:2x2x1
jax: 0.10.0
libtpu: 0.0.40
codegen_flags: <defaults>
</compile_context>

<pallas_src>
import numpy as np
import jax
import jax.numpy as jnp
from jax import lax
from jax.experimental import pallas as pl
from jax.experimental.pallas import tpu as pltpu

# ----- module hyper-parameters -------------------------------------------------
C_IN = 4                 # input channels
CB = 32                  # bottleneck channels
NF = 32                  # nb_filters
KSS = (39, 19, 9)        # odd-ified kernel sizes from ks=40
PADS = (19, 9, 4)        # padding = ks // 2
C_OUT = 4 * NF           # 128 channels after concat
BN_EPS = 1e-5

K_MAX = KSS[0]           # 39 real taps
P_MAX = PADS[0]          # 19
GROUP = 8                # taps per grouped MXU dot
N_GROUPS = (K_MAX + GROUP - 1) // GROUP       # 5
K_PAD = N_GROUPS * GROUP                      # 40 (tap 39 has zero weights)
GK = GROUP * CB                               # 256 contraction depth per dot


# ----- kernel: bottleneck + K-grouped conv branches + maxpool-conv + BN partials
def inception_branch_kernel(x_ref, wb_ref, bb_ref, wg_ref, wcp_ref, ball_ref,
                            y_ref, stats_ref, zsc):
    TB, L, _ = x_ref.shape
    ROWS = zsc.shape[0]

    wb = wb_ref[...]
    bb = bb_ref[...]
    wcp = wcp_ref[...]
    ball = ball_ref[...]

    # per-block BatchNorm partials (per-sequence means + centered M2)
    acc_mean = jnp.zeros((1, C_OUT), jnp.float32)
    acc_mean_sq = jnp.zeros((1, C_OUT), jnp.float32)
    acc_m2 = jnp.zeros((1, C_OUT), jnp.float32)

    for t in range(TB):                                      # TB is small & static
        x_t = x_ref[t]                                       # (L, C_IN) f32

        # bottleneck 1x1 conv == matmul over channels (contraction is only 4)
        xb = jnp.dot(x_t, wb, preferred_element_type=jnp.float32) + bb   # (L, CB)

        # im2col base: zsc[m, 32*j:32*j+32] = xb[m + j - P_MAX] (zero outside),
        # built with 8 row-padded copies lane-concatenated and ONE lane-dense
        # (ROWS, 256) store.  Group g's operand is then the 8-aligned row slice
        # zsc[8g : 8g+L, :] -- no per-tap shifts or reads.
        cols = []
        for j in range(GROUP):
            top = P_MAX - j                                  # 19 .. 12
            bot = ROWS - top - L
            cols.append(jnp.concatenate(
                [jnp.zeros((top, CB), jnp.float32), xb,
                 jnp.zeros((bot, CB), jnp.float32)], axis=0))
        zsc[...] = jnp.concatenate(cols, axis=1)             # (ROWS, 256) f32

        # 5 grouped dots, K=256 each (40 taps incl. one zero-weight pad tap)
        acc = jnp.zeros((L, C_OUT), jnp.float32)
        for g in range(N_GROUPS):
            base = GROUP * g                                 # 0, 8, 16, 24, 32
            op = zsc[base:base + L, :].astype(jnp.bfloat16)  # (L, 256) bf16
            acc = acc + jnp.dot(op, wg_ref[g],
                                preferred_element_type=jnp.float32)

        # maxpool(3, stride=1, pad=1) on the raw input, 1x1 conv into cols 96:128
        neg = jnp.full((1, C_IN), -jnp.inf, jnp.float32)
        x_lo = jnp.concatenate([neg, x_t[:L - 1, :]], axis=0)
        x_hi = jnp.concatenate([x_t[1:, :], neg], axis=0)
        mp = jnp.maximum(jnp.maximum(x_lo, x_t), x_hi)       # (L, C_IN)
        acc = acc + jnp.dot(mp, wcp, preferred_element_type=jnp.float32)

        # single lane-dense 128-wide store
        y_t = acc + ball                                     # (L, 128)
        y_ref[t] = y_t

        # per-sequence-centered BN partials (Chan/Welford combine later)
        mean_t = jnp.sum(y_t, axis=0, keepdims=True) * (1.0 / L)
        d = y_t - mean_t
        acc_mean = acc_mean + mean_t
        acc_mean_sq = acc_mean_sq + mean_t * mean_t
        acc_m2 = acc_m2 + jnp.sum(d * d, axis=0, keepdims=True)

    stats_ref[0] = jnp.concatenate([acc_mean, acc_mean_sq, acc_m2], axis=0)


# ----- batch-tile size: <=8 per step, keep >=2 grid steps when possible ---------
def _pick_tb(n):
    divisors = [d for d in range(1, min(n, 8) + 1) if n % d == 0]
    tb = max(divisors)
    if n > 1 and n // tb < 2:
        smaller = [d for d in divisors if n // d >= 2]
        if smaller:
            tb = max(smaller)
    return tb


# ----- wrapper -------------------------------------------------------------------
def inception_forward(x, p):
    N, c_in, L = x.shape
    assert c_in == C_IN
    x_nlc = jnp.transpose(x, (0, 2, 1)).astype(jnp.float32)      # (N, L, C_IN)

    # merged + K-grouped conv weights: (N_GROUPS, 256, 128) bf16
    wm = jnp.zeros((K_PAD, CB, C_OUT), jnp.float32)
    wm = wm.at[:K_MAX, :, 0 * NF:1 * NF].set(p['W0'])
    wm = wm.at[10:29, :, 1 * NF:2 * NF].set(p['W1'])             # center-aligned k=19
    wm = wm.at[15:24, :, 2 * NF:3 * NF].set(p['W2'])             # center-aligned k=9
    wg = wm.reshape(N_GROUPS, GK, C_OUT).astype(jnp.bfloat16)

    wc_pad = jnp.zeros((C_IN, C_OUT), jnp.float32).at[:, 3 * NF:].set(p['Wc'])
    bias_all = jnp.concatenate([p['b0'], p['b1'], p['b2'], p['bc']], axis=-1)

    TB = _pick_tb(N)
    NB = N // TB
    rows = ((L + K_PAD - GROUP + 7) // 8) * 8                    # L + 32, 8-aligned

    grid_spec = pltpu.PrefetchScalarGridSpec(
        num_scalar_prefetch=0,
        grid=(NB,),
        in_specs=[
            pl.BlockSpec((TB, L, C_IN), lambda n: (n, 0, 0)),
            pl.BlockSpec((C_IN, CB), lambda n: (0, 0)),
            pl.BlockSpec((1, CB), lambda n: (0, 0)),
            pl.BlockSpec((N_GROUPS, GK, C_OUT), lambda n: (0, 0, 0)),
            pl.BlockSpec((C_IN, C_OUT), lambda n: (0, 0)),
            pl.BlockSpec((1, C_OUT), lambda n: (0, 0)),
        ],
        out_specs=[
            pl.BlockSpec((TB, L, C_OUT), lambda n: (n, 0, 0)),
            pl.BlockSpec((1, 3, C_OUT), lambda n: (n, 0, 0)),
        ],
        scratch_shapes=[pltpu.VMEM((rows, GROUP * CB), jnp.float32)],
    )
    y, stats = pl.pallas_call(
        inception_branch_kernel,
        out_shape=(jax.ShapeDtypeStruct((N, L, C_OUT), jnp.float32),
                   jax.ShapeDtypeStruct((NB, 3, C_OUT), jnp.float32)),
        grid_spec=grid_spec,
        compiler_params=pltpu.CompilerParams(dimension_semantics=("parallel",)),
    )(x_nlc, p['Wb'], p['bb'], wg, wc_pad, bias_all)

    # combine per-sequence stats (equal counts L) -> BN scale / shift.
    # var = (sum_t M2_t + L * sum_t (mean_t - mean)^2) / (N*L)  (biased)
    sum_mean = jnp.sum(stats[:, 0, :], axis=0)                   # (C_OUT,)
    sum_mean_sq = jnp.sum(stats[:, 1, :], axis=0)
    sum_m2 = jnp.sum(stats[:, 2, :], axis=0)
    mean = sum_mean / float(N)
    between = jnp.maximum(sum_mean_sq - float(N) * mean * mean, 0.0) * float(L)
    var = (sum_m2 + between) / float(N * L)
    scale_v = p['gamma'].reshape(-1) * lax.rsqrt(var + BN_EPS)
    shift_v = p['beta'].reshape(-1) - mean * scale_v

    # fused epilogue: scale*y + shift, ReLU and NLC->NCL transpose in ONE XLA
    # fusion (single HBM round trip; replaces the previous Pallas bn_relu
    # kernel + separate XLA transpose, which cost two passes).
    out = jnp.maximum(y * scale_v.reshape(1, 1, C_OUT)
                      + shift_v.reshape(1, 1, C_OUT), 0.0)
    return jnp.transpose(out, (0, 2, 1))                         # (N, 4*NF, L)


# ----- deterministic synthetic parameters ---------------------------------------
def init_params(key):
    ks = jax.random.split(key, 12)
    s = 0.1
    return {
        'Wb': s * jax.random.normal(ks[0], (C_IN, CB), jnp.float32),
        'bb': s * jax.random.normal(ks[1], (1, CB), jnp.float32),
        'W0': s * jax.random.normal(ks[2], (KSS[0], CB, NF), jnp.float32),
        'b0': s * jax.random.normal(ks[3], (1, NF), jnp.float32),
        'W1': s * jax.random.normal(ks[4], (KSS[1], CB, NF), jnp.float32),
        'b1': s * jax.random.normal(ks[5], (1, NF), jnp.float32),
        'W2': s * jax.random.normal(ks[6], (KSS[2], CB, NF), jnp.float32),
        'b2': s * jax.random.normal(ks[7], (1, NF), jnp.float32),
        'Wc': s * jax.random.normal(ks[8], (C_IN, NF), jnp.float32),
        'bc': s * jax.random.normal(ks[9], (1, NF), jnp.float32),
        'gamma': 1.0 + s * jax.random.normal(ks[10], (1, C_OUT), jnp.float32),
        'beta': s * jax.random.normal(ks[11], (1, C_OUT), jnp.float32),
    }


# ----- pure-JAX reference (f32, for correctness check) ----------------------------
def ref_forward(x, p):
    xt = jnp.transpose(x, (0, 2, 1)).astype(jnp.float32)
    xb = jnp.einsum('nlc,cd->nld', xt, p['Wb']) + p['bb']
    branches = []
    for i, (W, b) in enumerate(((p['W0'], p['b0']), (p['W1'], p['b1']),
                                (p['W2'], p['b2']))):
        o = lax.conv_general_dilated(xb, W, window_strides=(1,),
                                     padding=[(PADS[i], PADS[i])],
                                     dimension_numbers=('NWC', 'WIO', 'NWC'))
        branches.append(o + b)
    xp = jnp.pad(xt, ((0, 0), (1, 1), (0, 0)), constant_values=-jnp.inf)
    mp = jnp.maximum(jnp.maximum(xp[:, :-2], xp[:, 1:-1]), xp[:, 2:])
    branches.append(jnp.einsum('nlc,cd->nld', mp, p['Wc']) + p['bc'])
    y = jnp.concatenate(branches, axis=-1)
    mean = jnp.mean(y, axis=(0, 1), keepdims=True)
    var = jnp.mean(jnp.square(y - mean), axis=(0, 1), keepdims=True)
    out = jnp.maximum((y - mean) * lax.rsqrt(var + BN_EPS) * p['gamma'] + p['beta'],
                      0.0)
    return jnp.transpose(out, (0, 2, 1))


if __name__ == "__main__":
    key = jax.random.PRNGKey(0)
    pkey, xkey = jax.random.split(key)
    params = init_params(pkey)

    N, L = 2, 16
    x = jax.random.normal(xkey, (N, C_IN, L), jnp.float32)       # PyTorch NCL input

    out = jax.block_until_ready(inception_forward(x, params))
    ref = jax.block_until_ready(ref_forward(x, params))

    assert out.shape == (N, C_OUT, L)
    # bf16 MXU operands in the conv branches slightly loosen the f32 agreement.
    np.testing.assert_allclose(np.asarray(out), np.asarray(ref),
                               rtol=2e-2, atol=2e-2)
    print("KERNEL_OK")
</pallas_src>

<mosaic_0001>
module attributes {stable_mosaic.version = 11 : i64} {
  func.func @inception_branch_kernel(%arg0: i32, %arg1: memref<1x16x4xf32, #tpu.memory_space<vmem>>, %arg2: memref<4x32xf32, #tpu.memory_space<vmem>>, %arg3: memref<1x32xf32, #tpu.memory_space<vmem>>, %arg4: memref<5x256x128xbf16, #tpu.memory_space<vmem>>, %arg5: memref<4x128xf32, #tpu.memory_space<vmem>>, %arg6: memref<1x128xf32, #tpu.memory_space<vmem>>, %arg7: memref<1x16x128xf32, #tpu.memory_space<vmem>>, %arg8: memref<1x3x128xf32, #tpu.memory_space<vmem>>, %arg9: memref<48x256xf32, #tpu.memory_space<vmem>>) attributes {dimension_semantics = [#tpu.dimension_semantics<parallel>], iteration_bounds = array<i64: 2>, scalar_prefetch = 0 : i64, scratch_operands = 1 : i64, tpu.core_type = #tpu.core_type<tc>, window_params = [{transform_indices = @transform_0, window_bounds = array<i64: 1, 16, 4>}, {pipeline_mode = #tpu.pipeline_mode<synchronous>, transform_indices = @transform_1, window_bounds = array<i64: 4, 32>}, {pipeline_mode = #tpu.pipeline_mode<synchronous>, transform_indices = @transform_2, window_bounds = array<i64: 1, 32>}, {pipeline_mode = #tpu.pipeline_mode<synchronous>, transform_indices = @transform_3, window_bounds = array<i64: 5, 256, 128>}, {pipeline_mode = #tpu.pipeline_mode<synchronous>, transform_indices = @transform_4, window_bounds = array<i64: 4, 128>}, {pipeline_mode = #tpu.pipeline_mode<synchronous>, transform_indices = @transform_5, window_bounds = array<i64: 1, 128>}, {transform_indices = @transform_6, window_bounds = array<i64: 1, 16, 128>}, {transform_indices = @transform_7, window_bounds = array<i64: 1, 3, 128>}]} {
    %c0 = arith.constant 0 : index
    %c0_0 = arith.constant 0 : index
    %0 = vector.load %arg2[%c0, %c0_0] : memref<4x32xf32, #tpu.memory_space<vmem>>, vector<4x32xf32>
    %c0_1 = arith.constant 0 : index
    %c0_2 = arith.constant 0 : index
    %1 = vector.load %arg3[%c0_1, %c0_2] : memref<1x32xf32, #tpu.memory_space<vmem>>, vector<1x32xf32>
    %c0_3 = arith.constant 0 : index
    %c0_4 = arith.constant 0 : index
    %2 = vector.load %arg5[%c0_3, %c0_4] : memref<4x128xf32, #tpu.memory_space<vmem>>, vector<4x128xf32>
    %c0_5 = arith.constant 0 : index
    %c0_6 = arith.constant 0 : index
    %3 = vector.load %arg6[%c0_5, %c0_6] : memref<1x128xf32, #tpu.memory_space<vmem>>, vector<1x128xf32>
    %cst = arith.constant 0.000000e+00 : f32
    %4 = vector.broadcast %cst : f32 to vector<1x128xf32>
    %cst_7 = arith.constant 0.000000e+00 : f32
    %5 = vector.broadcast %cst_7 : f32 to vector<1x128xf32>
    %cst_8 = arith.constant 0.000000e+00 : f32
    %6 = vector.broadcast %cst_8 : f32 to vector<1x128xf32>
    %c0_9 = arith.constant 0 : index
    %c0_10 = arith.constant 0 : index
    %c0_11 = arith.constant 0 : index
    %7 = vector.load %arg1[%c0_9, %c0_10, %c0_11] : memref<1x16x4xf32, #tpu.memory_space<vmem>>, vector<1x16x4xf32>
    %8 = vector.shape_cast %7 : vector<1x16x4xf32> to vector<16x4xf32>
    %cst_12 = arith.constant dense<0.000000e+00> : vector<16x32xf32>
    %9 = tpu.matmul %8, %0, %cst_12 {dimension_numbers = #tpu.dot_dimension_numbers<[1], [0], [0], [1], [0, 0, 1, 1], [], []>} : vector<16x4xf32>, vector<4x32xf32>, vector<16x32xf32> -> vector<16x32xf32>
    %10 = vector.broadcast %1 : vector<1x32xf32> to vector<16x32xf32>
    %11 = arith.addf %9, %10 : vector<16x32xf32>
    %cst_13 = arith.constant 0.000000e+00 : f32
    %12 = vector.broadcast %cst_13 : f32 to vector<19x32xf32>
    %cst_14 = arith.constant 0.000000e+00 : f32
    %13 = vector.broadcast %cst_14 : f32 to vector<13x32xf32>
    %14 = tpu.concatenate %12, %11, %13 in 0 : vector<19x32xf32>, vector<16x32xf32>, vector<13x32xf32> -> vector<48x32xf32>
    %cst_15 = arith.constant 0.000000e+00 : f32
    %15 = vector.broadcast %cst_15 : f32 to vector<18x32xf32>
    %cst_16 = arith.constant 0.000000e+00 : f32
    %16 = vector.broadcast %cst_16 : f32 to vector<14x32xf32>
    %17 = tpu.concatenate %15, %11, %16 in 0 : vector<18x32xf32>, vector<16x32xf32>, vector<14x32xf32> -> vector<48x32xf32>
    %cst_17 = arith.constant 0.000000e+00 : f32
    %18 = vector.broadcast %cst_17 : f32 to vector<17x32xf32>
    %cst_18 = arith.constant 0.000000e+00 : f32
    %19 = vector.broadcast %cst_18 : f32 to vector<15x32xf32>
    %20 = tpu.concatenate %18, %11, %19 in 0 : vector<17x32xf32>, vector<16x32xf32>, vector<15x32xf32> -> vector<48x32xf32>
    %cst_19 = arith.constant 0.000000e+00 : f32
    %21 = vector.broadcast %cst_19 : f32 to vector<16x32xf32>
    %cst_20 = arith.constant 0.000000e+00 : f32
    %22 = vector.broadcast %cst_20 : f32 to vector<16x32xf32>
    %23 = tpu.concatenate %21, %11, %22 in 0 : vector<16x32xf32>, vector<16x32xf32>, vector<16x32xf32> -> vector<48x32xf32>
    %cst_21 = arith.constant 0.000000e+00 : f32
    %24 = vector.broadcast %cst_21 : f32 to vector<15x32xf32>
    %cst_22 = arith.constant 0.000000e+00 : f32
    %25 = vector.broadcast %cst_22 : f32 to vector<17x32xf32>
    %26 = tpu.concatenate %24, %11, %25 in 0 : vector<15x32xf32>, vector<16x32xf32>, vector<17x32xf32> -> vector<48x32xf32>
    %cst_23 = arith.constant 0.000000e+00 : f32
    %27 = vector.broadcast %cst_23 : f32 to vector<14x32xf32>
    %cst_24 = arith.constant 0.000000e+00 : f32
    %28 = vector.broadcast %cst_24 : f32 to vector<18x32xf32>
    %29 = tpu.concatenate %27, %11, %28 in 0 : vector<14x32xf32>, vector<16x32xf32>, vector<18x32xf32> -> vector<48x32xf32>
    %cst_25 = arith.constant 0.000000e+00 : f32
    %30 = vector.broadcast %cst_25 : f32 to vector<13x32xf32>
    %cst_26 = arith.constant 0.000000e+00 : f32
    %31 = vector.broadcast %cst_26 : f32 to vector<19x32xf32>
    %32 = tpu.concatenate %30, %11, %31 in 0 : vector<13x32xf32>, vector<16x32xf32>, vector<19x32xf32> -> vector<48x32xf32>
    %cst_27 = arith.constant 0.000000e+00 : f32
    %33 = vector.broadcast %cst_27 : f32 to vector<12x32xf32>
    %cst_28 = arith.constant 0.000000e+00 : f32
    %34 = vector.broadcast %cst_28 : f32 to vector<20x32xf32>
    %35 = tpu.concatenate %33, %11, %34 in 0 : vector<12x32xf32>, vector<16x32xf32>, vector<20x32xf32> -> vector<48x32xf32>
    %36 = tpu.concatenate %14, %17, %20, %23, %26, %29, %32, %35 in 1 : vector<48x32xf32>, vector<48x32xf32>, vector<48x32xf32>, vector<48x32xf32>, vector<48x32xf32>, vector<48x32xf32>, vector<48x32xf32>, vector<48x32xf32> -> vector<48x256xf32>
    %c0_29 = arith.constant 0 : index
    %c0_30 = arith.constant 0 : index
    %37 = vector.load %arg9[%c0_29, %c0_30] : memref<48x256xf32, #tpu.memory_space<vmem>>, vector<48x256xf32>
    tpu.vector_store %arg9[%c0_29, %c0_30], %36 {strides = array<i32>} : memref<48x256xf32, #tpu.memory_space<vmem>>, vector<48x256xf32>,
    %cst_31 = arith.constant 0.000000e+00 : f32
    %38 = vector.broadcast %cst_31 : f32 to vector<16x128xf32>
    %c0_32 = arith.constant 0 : index
    %c0_33 = arith.constant 0 : index
    %39 = vector.load %arg9[%c0_32, %c0_33] : memref<48x256xf32, #tpu.memory_space<vmem>>, vector<16x256xf32>
    %40 = arith.truncf %39 : vector<16x256xf32> to vector<16x256xbf16>
    %c0_34 = arith.constant 0 : index
    %c0_35 = arith.constant 0 : index
    %c0_36 = arith.constant 0 : index
    %41 = vector.load %arg4[%c0_34, %c0_35, %c0_36] : memref<5x256x128xbf16, #tpu.memory_space<vmem>>, vector<1x256x128xbf16>
    %42 = vector.shape_cast %41 : vector<1x256x128xbf16> to vector<256x128xbf16>
    %cst_37 = arith.constant dense<0.000000e+00> : vector<16x128xf32>
    %43 = tpu.matmul %40, %42, %cst_37 {dimension_numbers = #tpu.dot_dimension_numbers<[1], [0], [0], [1], [0, 0, 1, 1], [], []>} : vector<16x256xbf16>, vector<256x128xbf16>, vector<16x128xf32> -> vector<16x128xf32>
    %44 = arith.addf %38, %43 : vector<16x128xf32>
    %c8 = arith.constant 8 : index
    %c0_38 = arith.constant 0 : index
    %45 = vector.load %arg9[%c8, %c0_38] : memref<48x256xf32, #tpu.memory_space<vmem>>, vector<16x256xf32>
    %46 = arith.truncf %45 : vector<16x256xf32> to vector<16x256xbf16>
    %c1 = arith.constant 1 : index
    %c0_39 = arith.constant 0 : index
    %c0_40 = arith.constant 0 : index
    %47 = vector.load %arg4[%c1, %c0_39, %c0_40] : memref<5x256x128xbf16, #tpu.memory_space<vmem>>, vector<1x256x128xbf16>
    %48 = vector.shape_cast %47 : vector<1x256x128xbf16> to vector<256x128xbf16>
    %cst_41 = arith.constant dense<0.000000e+00> : vector<16x128xf32>
    %49 = tpu.matmul %46, %48, %cst_41 {dimension_numbers = #tpu.dot_dimension_numbers<[1], [0], [0], [1], [0, 0, 1, 1], [], []>} : vector<16x256xbf16>, vector<256x128xbf16>, vector<16x128xf32> -> vector<16x128xf32>
    %50 = arith.addf %44, %49 : vector<16x128xf32>
    %c16 = arith.constant 16 : index
    %c0_42 = arith.constant 0 : index
    %51 = vector.load %arg9[%c16, %c0_42] : memref<48x256xf32, #tpu.memory_space<vmem>>, vector<16x256xf32>
    %52 = arith.truncf %51 : vector<16x256xf32> to vector<16x256xbf16>
    %c2 = arith.constant 2 : index
    %c0_43 = arith.constant 0 : index
    %c0_44 = arith.constant 0 : index
    %53 = vector.load %arg4[%c2, %c0_43, %c0_44] : memref<5x256x128xbf16, #tpu.memory_space<vmem>>, vector<1x256x128xbf16>
    %54 = vector.shape_cast %53 : vector<1x256x128xbf16> to vector<256x128xbf16>
    %cst_45 = arith.constant dense<0.000000e+00> : vector<16x128xf32>
    %55 = tpu.matmul %52, %54, %cst_45 {dimension_numbers = #tpu.dot_dimension_numbers<[1], [0], [0], [1], [0, 0, 1, 1], [], []>} : vector<16x256xbf16>, vector<256x128xbf16>, vector<16x128xf32> -> vector<16x128xf32>
    %56 = arith.addf %50, %55 : vector<16x128xf32>
    %c24 = arith.constant 24 : index
    %c0_46 = arith.constant 0 : index
    %57 = vector.load %arg9[%c24, %c0_46] : memref<48x256xf32, #tpu.memory_space<vmem>>, vector<16x256xf32>
    %58 = arith.truncf %57 : vector<16x256xf32> to vector<16x256xbf16>
    %c3 = arith.constant 3 : index
    %c0_47 = arith.constant 0 : index
    %c0_48 = arith.constant 0 : index
    %59 = vector.load %arg4[%c3, %c0_47, %c0_48] : memref<5x256x128xbf16, #tpu.memory_space<vmem>>, vector<1x256x128xbf16>
    %60 = vector.shape_cast %59 : vector<1x256x128xbf16> to vector<256x128xbf16>
    %cst_49 = arith.constant dense<0.000000e+00> : vector<16x128xf32>
    %61 = tpu.matmul %58, %60, %cst_49 {dimension_numbers = #tpu.dot_dimension_numbers<[1], [0], [0], [1], [0, 0, 1, 1], [], []>} : vector<16x256xbf16>, vector<256x128xbf16>, vector<16x128xf32> -> vector<16x128xf32>
    %62 = arith.addf %56, %61 : vector<16x128xf32>
    %c32 = arith.constant 32 : index
    %c0_50 = arith.constant 0 : index
    %63 = vector.load %arg9[%c32, %c0_50] : memref<48x256xf32, #tpu.memory_space<vmem>>, vector<16x256xf32>
    %64 = arith.truncf %63 : vector<16x256xf32> to vector<16x256xbf16>
    %c4 = arith.constant 4 : index
    %c0_51 = arith.constant 0 : index
    %c0_52 = arith.constant 0 : index
    %65 = vector.load %arg4[%c4, %c0_51, %c0_52] : memref<5x256x128xbf16, #tpu.memory_space<vmem>>, vector<1x256x128xbf16>
    %66 = vector.shape_cast %65 : vector<1x256x128xbf16> to vector<256x128xbf16>
    %cst_53 = arith.constant dense<0.000000e+00> : vector<16x128xf32>
    %67 = tpu.matmul %64, %66, %cst_53 {dimension_numbers = #tpu.dot_dimension_numbers<[1], [0], [0], [1], [0, 0, 1, 1], [], []>} : vector<16x256xbf16>, vector<256x128xbf16>, vector<16x128xf32> -> vector<16x128xf32>
    %68 = arith.addf %62, %67 : vector<16x128xf32>
    %cst_54 = arith.constant 0xFF800000 : f32
    %69 = vector.broadcast %cst_54 : f32 to vector<1x4xf32>
    %70 = vector.extract_strided_slice %8 {offsets = [0, 0], sizes = [15, 4], strides = [1, 1]} : vector<16x4xf32> to vector<15x4xf32>
    %71 = tpu.concatenate %69, %70 in 0 : vector<1x4xf32>, vector<15x4xf32> -> vector<16x4xf32>
    %72 = vector.extract_strided_slice %8 {offsets = [1, 0], sizes = [15, 4], strides = [1, 1]} : vector<16x4xf32> to vector<15x4xf32>
    %73 = tpu.concatenate %72, %69 in 0 : vector<15x4xf32>, vector<1x4xf32> -> vector<16x4xf32>
    %74 = arith.maximumf %71, %8 : vector<16x4xf32>
    %75 = arith.maximumf %74, %73 : vector<16x4xf32>
    %cst_55 = arith.constant dense<0.000000e+00> : vector<16x128xf32>
    %76 = tpu.matmul %75, %2, %cst_55 {dimension_numbers = #tpu.dot_dimension_numbers<[1], [0], [0], [1], [0, 0, 1, 1], [], []>} : vector<16x4xf32>, vector<4x128xf32>, vector<16x128xf32> -> vector<16x128xf32>
    %77 = arith.addf %68, %76 : vector<16x128xf32>
    %78 = vector.broadcast %3 : vector<1x128xf32> to vector<16x128xf32>
    %79 = arith.addf %77, %78 : vector<16x128xf32>
    %c0_56 = arith.constant 0 : index
    %c0_57 = arith.constant 0 : index
    %c0_58 = arith.constant 0 : index
    %80 = vector.load %arg7[%c0_56, %c0_57, %c0_58] : memref<1x16x128xf32, #tpu.memory_space<vmem>>, vector<1x16x128xf32>
    %81 = vector.shape_cast %80 : vector<1x16x128xf32> to vector<16x128xf32>
    %82 = vector.shape_cast %79 : vector<16x128xf32> to vector<1x16x128xf32>
    tpu.vector_store %arg7[%c0_56, %c0_57, %c0_58], %82 {strides = array<i32>} : memref<1x16x128xf32, #tpu.memory_space<vmem>>, vector<1x16x128xf32>,
    %cst_59 = arith.constant dense<0.000000e+00> : vector<128xf32>
    %83 = vector.multi_reduction <add>, %79, %cst_59 [0] : vector<16x128xf32> to vector<128xf32>
    %84 = vector.shape_cast %83 : vector<128xf32> to vector<1x128xf32>
    %cst_60 = arith.constant 6.250000e-02 : f32
    %85 = vector.broadcast %cst_60 : f32 to vector<1x128xf32>
    %86 = arith.mulf %84, %85 : vector<1x128xf32>
    %87 = vector.broadcast %86 : vector<1x128xf32> to vector<16x128xf32>
    %88 = arith.subf %79, %87 : vector<16x128xf32>
    %89 = arith.addf %4, %86 : vector<1x128xf32>
    %90 = arith.mulf %86, %86 : vector<1x128xf32>
    %91 = arith.addf %5, %90 : vector<1x128xf32>
    %92 = arith.mulf %88, %88 : vector<16x128xf32>
    %cst_61 = arith.constant dense<0.000000e+00> : vector<128xf32>
    %93 = vector.multi_reduction <add>, %92, %cst_61 [0] : vector<16x128xf32> to vector<128xf32>
    %94 = vector.shape_cast %93 : vector<128xf32> to vector<1x128xf32>
    %95 = arith.addf %6, %94 : vector<1x128xf32>
    %96 = tpu.concatenate %89, %91, %95 in 0 : vector<1x128xf32>, vector<1x128xf32>, vector<1x128xf32> -> vector<3x128xf32>
    %c0_62 = arith.constant 0 : index
    %c0_63 = arith.constant 0 : index
    %c0_64 = arith.constant 0 : index
    %97 = vector.load %arg8[%c0_62, %c0_63, %c0_64] : memref<1x3x128xf32, #tpu.memory_space<vmem>>, vector<1x3x128xf32>
    %98 = vector.shape_cast %97 : vector<1x3x128xf32> to vector<3x128xf32>
    %99 = vector.shape_cast %96 : vector<3x128xf32> to vector<1x3x128xf32>
    tpu.vector_store %arg8[%c0_62, %c0_63, %c0_64], %99 {strides = array<i32>} : memref<1x3x128xf32, #tpu.memory_space<vmem>>, vector<1x3x128xf32>,
    return
  }
  func.func @transform_0(%arg0: i32) -> (i32, i32, i32) {
    %c0_i32 = arith.constant 0 : i32
    %c0_i32_0 = arith.constant 0 : i32
    %c0_i32_1 = arith.constant 0 : i32
    return %arg0, %c0_i32, %c0_i32_0 : i32, i32, i32
  }
  func.func @transform_1(%arg0: i32) -> (i32, i32) {
    %c0_i32 = arith.constant 0 : i32
    %c0_i32_0 = arith.constant 0 : i32
    %c0_i32_1 = arith.constant 0 : i32
    return %c0_i32, %c0_i32_0 : i32, i32
  }
  func.func @transform_2(%arg0: i32) -> (i32, i32) {
    %c0_i32 = arith.constant 0 : i32
    %c0_i32_0 = arith.constant 0 : i32
    %c0_i32_1 = arith.constant 0 : i32
    return %c0_i32, %c0_i32_0 : i32, i32
  }
  func.func @transform_3(%arg0: i32) -> (i32, i32, i32) {
    %c0_i32 = arith.constant 0 : i32
    %c0_i32_0 = arith.constant 0 : i32
    %c0_i32_1 = arith.constant 0 : i32
    %c0_i32_2 = arith.constant 0 : i32
    return %c0_i32, %c0_i32_0, %c0_i32_1 : i32, i32, i32
  }
  func.func @transform_4(%arg0: i32) -> (i32, i32) {
    %c0_i32 = arith.constant 0 : i32
    %c0_i32_0 = arith.constant 0 : i32
    %c0_i32_1 = arith.constant 0 : i32
    return %c0_i32, %c0_i32_0 : i32, i32
  }
  func.func @transform_5(%arg0: i32) -> (i32, i32) {
    %c0_i32 = arith.constant 0 : i32
    %c0_i32_0 = arith.constant 0 : i32
    %c0_i32_1 = arith.constant 0 : i32
    return %c0_i32, %c0_i32_0 : i32, i32
  }
  func.func @transform_6(%arg0: i32) -> (i32, i32, i32) {
    %c0_i32 = arith.constant 0 : i32
    %c0_i32_0 = arith.constant 0 : i32
    %c0_i32_1 = arith.constant 0 : i32
    return %arg0, %c0_i32, %c0_i32_0 : i32, i32, i32
  }
  func.func @transform_7(%arg0: i32) -> (i32, i32, i32) {
    %c0_i32 = arith.constant 0 : i32
    %c0_i32_0 = arith.constant 0 : i32
    %c0_i32_1 = arith.constant 0 : i32
    return %arg0, %c0_i32, %c0_i32_0 : i32, i32, i32
  }
}

</mosaic_0001>

<bundles_post_ra>
// kernel: tpu_custom_call.1
= control target key start
LH: loop header
LB: loop body
LE: loop exit
PB: predicated region body
PF: predicated region fallthrough
CT: control target
= control target key end

     0   :  { %13 = vsyncpa [#allocation4], 0  ;;  %s2567_s0 = inlined_call_operand.vmem [shape: f32[2,16,4], index: 0, kind: input, shape index: {}]   ;;  %s2568_s1 = inlined_call_operand.vmem [shape: f32[4,32], index: 1, kind: input, shape index: {}]   ;;  %s2569_s2 = inlined_call_operand.vmem [shape: f32[1,32], index: 2, kind: input, shape index: {}]   ;;  %s2570_s3 = inlined_call_operand.hbm [shape: bf16[5,256,128], index: 3, kind: input, shape index: {}]   ;;  %s2571_s4 = inlined_call_operand.vmem [shape: f32[4,128], index: 4, kind: input, shape index: {}]   ;;  %s2572_s5 = inlined_call_operand.vmem [shape: f32[1,128], index: 5, kind: input, shape index: {}]   ;;  %s2573_s6 = inlined_call_operand.hbm [shape: f32[2,16,128], index: 6, kind: output, shape index: {0}]   ;;  %s2574_s7 = inlined_call_operand.vmem [shape: f32[2,3,128], index: 7, kind: output, shape index: {1}]  }
   0x1   :  { %14 = vsyncpa [#allocation5], 0 }
   0x2   :  { %16 = vsyncpa [#allocation5 + $0x1], 0  ;;  %s2264_s24 = smov 0   ;;  %s2266_s25 = smov 0  }
   0x3   :  { %s2268_s26 = smov 0   ;;  %s2270_s27 = smov 0  }
   0x4 LB: > { %s2285_s28 = sadd.s32 4294967295, %s2212_s27   ;;  %s1708_s29 = sadd.s32 4294967294, %s2212_s27   ;;  %s2212_s27 = sphi %s2270_s27, %s2582_s27   ;;  %s2208_s26 = sphi %s2268_s26, %s2581_s26   ;;  %s2204_s25 = sphi %s2266_s25, %s2580_s25   ;;  %s2200_s24 = sphi %s2264_s24, %s2579_s24  }
   0x5   : > { %s2289_s30 = sadd.s32 1, %s2212_s27   ;;  %s160_s8 = sadd.s32 1, %s2208_s26 }
   0x6   : > { %s157_s9 = ssub.s32 %s2212_s27, %s2289_s30  ;;  %p170_p0 = scmp.ne.s32.totalorder %s2208_s26, %s2204_s25 }
   0x7   : > { %p158_p1 = scmp.eq.s32.totalorder %s157_s9, 0  ;;  %p171_p2 = scmp.eq.s32.totalorder %s2285_s28, 1 }
   0x8   : > { %p176_p3 = scmp.ne.s32.totalorder %s2204_s25, %s2200_s24  ;;  %p177_p4 = scmp.eq.s32.totalorder %s1708_s29, 1 }
   0x9   : > { %s2300_s10 = scalar_select %p158_p1, %s2208_s26, %s160_s8  }
   0xa   : > { %p2302_p5 = por %p171_p2, %p170_p0  ;;  %p2306_p6 = por %p177_p4, %p176_p3 }
   0xb   : > { %p1709_p7 = scmp.ge.s32.totalorder %s2212_s27, 1  ;;  %p210_p8 = scmp.lt.s32.totalorder %s2212_s27, 3 }
   0xc   : > { %s2576_s12 = scalar_select %p2306_p6, 1, 0 }
   0xd   : > { %p1953_p9 = scmp.eq.s32.totalorder %s2285_s28, 0  ;;  %p2313_p10 = pnand %p1709_p7, %p210_p8 }
   0xe   : > { %s2214_s14 = smov [#allocation3]  }
   0xf   : > { %s228_s15 = sshll.u32 %s2214_s14, 4  ;;  %p1945_p11 = pneg %p2313_p10  ;;  %s229_s15 = int_to_ptr.vmem [resolvable:$true] %s228_s15 }
  0x10   : > { %s2133_s16 = scalar_lea.vmem %s229_s15, 10240  ;;  %p2141_p3 = scmp.lt.s32.totalorder %s229_s15, %s229_s15 }
  0x11   : > { %p1946_p12 = pnand %p1953_p9, %p1945_p11  ;;  %p2134_p0 = scmp.ne.s32.totalorder %s229_s15, %s2133_s16 }
  0x12   : > { %p2142_p4 = scmp.lt.s32.totalorder %s2133_s16, %s2133_s16 }
  0x13   : > { %p2124_p13 = pneg %p1946_p12 }
  0x14   : > { %p2143_p6 = por %p2142_p4, %p2141_p3 }
  0x15   : > { %p2136_p1 = pnand %p2134_p0, %p2124_p13 }
  0x17   : > { %p2137_p2 = pneg %p2136_p1 }
  0x19   : > { %p2144_p7 = pnand %p2143_p6, %p2137_p2 }
  0x1b   : > { %2147 = shalt.err (!%p2144_p7)
}
  0x1c   : > { %s2215_s17 = smov 64   ;;  %s2216_s18 = smov 4  }
  0x1d   : > { %1948 = dma.hbm_to_vmem [thread:$0]  (!%p1946_p12), %s2570_s3, 10240, %s229_s15, [#allocation4], %s2215_s17, %s2215_s17, %s2216_s18  }
  0x1e   : > { %258 = sbr.rel (%p2313_p10) target bundleno = 692 (0x2b4), region = 44 }
  0x23   : > { %2191 = dma.done.wait (%p1953_p9), [#allocation4], 10240  }
  0x24   : > { %2193 = vsyncadd (%p1953_p9), [#allocation4], 4294957056  ;;  %p294_p8 = scmp.lt.s32.totalorder %s2285_s28, 1  ;;  %vm323_vm0 = vcmask 1043456   ;;  %vm316_vm1 = vcmask 31744   ;;  %vm421_vm2 = vcmask 1040384  }
  0x25   : > { %v304_v0 = vld [vmem:[%s2568_s1] sm:$0xf]  ;;  %vm429_vm3 = vcmask 1046528   ;;  %v2042_v10 = vld [vmem:[#allocation3 + $0xf8] sm:$0xff]   ;;  %v2046_v14 = vld [vmem:[#allocation3 + $0xf0] sm:$0xff]   ;;  %vm446_vm4 = vcmask 1044480  }
  0x26   : > { %s2332_s21 = scalar_select %p294_p8, %s2285_s28, 1  ;;  %1929 = vmatprep.subr.msk.mxu0 %vm323_vm0, %v304_v0  ;;  %v2043_v11 = vld [vmem:[#allocation3 + $0x78] sm:$0xff]   ;;  %v2047_v15 = vld [vmem:[#allocation3 + $0x70] sm:$0xff]   ;;  %1816 = vmatprep.subr.bf16.mxu1 %v2042_v10  ;;  %v2050_v18 = vld [vmem:[#allocation3 + $0xe8] sm:$0xff]   ;;  %vm438_vm5 = vcmask 1045504   ;;  %vm413_vm6 = vcmask 1041408  }
  0x27   : > { %1930 = vmatpush3.msk.msra.mxu0 %vm323_vm0, %v304_v0  ;;  %v2044_v12 = vld [vmem:[#allocation3 + $0xb8] sm:$0xff]   ;;  %v2048_v16 = vld [vmem:[#allocation3 + $0xb0] sm:$0xff]   ;;  %v2051_v19 = vld [vmem:[#allocation3 + $0x68] sm:$0xff]   ;;  %s2217_s16 = smov 64   ;;  %s2218_s17 = smov 32   ;;  %v2219_v62 = vmov 0.0  }
  0x28   : > { %s1811_s22 = sshll.u32 %s2332_s21, 4  ;;  %v2045_v13 = vld [vmem:[#allocation3 + $0x38] sm:$0xff]   ;;  %1838 = vmatprep.subr.bf16.mxu0 %v2043_v11  ;;  %1817 = vmatpush3.bf16.msra.mxu1 %v2044_v12  ;;  %v2049_v17 = vld [vmem:[#allocation3 + $0x30] sm:$0xff]   ;;  %v2052_v20 = vld [vmem:[#allocation3 + $0xa8] sm:$0xff]   ;;  %vm404_vm7 = vcmask 1042432   ;;  %s2220_s18 = smov 96  }
  0x29   : > { %s298_s8 = scalar_lea.vmem %s2567_s0, %s1811_s22  ;;  %1818 = vmatprep.subr.bf16.mxu1 %v2046_v14  ;;  %v2053_v21 = vld [vmem:[#allocation3 + $0x28] sm:$0xff]   ;;  %v2054_v22 = vld [vmem:[#allocation3 + $0xe0] sm:$0xff]   ;;  %v2058_v26 = vld [vmem:[#allocation3 + $0xd8] sm:$0xff]   ;;  %vm532_vm8 = vcmask 261120   ;;  %vm537_vm9 = vcmask 523264   ;;  %vm542_vm10 = vcmask 785408  }
  0x2a   : > { %v2341_v1 = vld [vmem:[%s298_s8] sm:$0xff]  ;;  %v2343_v2 = vld [vmem:[%s298_s8 + $0x8] sm:$0xff]  ;;  %v2059_v27 = vld [vmem:[#allocation3 + $0x58] sm:$0xff]   ;;  %s285_s22 = sand.u32 1, %s2204_s25   ;;  %s1812_s14 = sshll.u32 %s2285_s28, 8 }
  0x2b   : > { %1931 = vmatprep.mubr.msk.f32.mxu0 %vm316_vm1, %v2341_v1  ;;  %v1451_v3 = vrot.slane %v2341_v1, 7  ;;  %v1452_v4 = vrot.slane %v2343_v2, 7  ;;  %v1458_v5 = vrot.slane %v2343_v2, 1  ;;  %v2055_v23 = vld [vmem:[#allocation3 + $0x60] sm:$0xff]   ;;  %v2060_v28 = vld [vmem:[#allocation3 + $0x98] sm:$0xff]   ;;  %v2062_v30 = vld [vmem:[#allocation3 + $0xd0] sm:$0xff]  }
  0x2c   : > { %1932 = vmatmul.mubr.msk.f32.vlgmr.msra.gmra.mxu0 %vm316_vm1, %v2343_v2  ;;  %1819 = vmatpush3.bf16.msra.mxu1 %v2048_v16  ;;  %v2056_v24 = vld [vmem:[#allocation3 + $0xa0] sm:$0xff]   ;;  %v2061_v29 = vld [vmem:[#allocation3 + $0x18] sm:$0xff]   ;;  %v2063_v31 = vld [vmem:[#allocation3 + $0x50] sm:$0xff]   ;;  %s1714_s23 = sshll.u32 %s285_s22, 4  ;;  %s2221_s28 = smov [#allocation6]  }
  0x2d   : > { %v1453_v6 = vsel %vm421_vm2, %v1451_v3, %v1452_v4  ;;  %v1462_v7 = vsel %vm429_vm3, %v1458_v5, -inf  ;;  %1839 = vmatpush3.bf16.msra.mxu0 %v2045_v13  ;;  %1820 = vmatprep.subr.bf16.mxu1 %v2050_v18  ;;  %v2057_v25 = vld [vmem:[#allocation3 + $0x20] sm:$0xff]   ;;  %v2064_v32 = vld [vmem:[#allocation3 + $0x90] sm:$0xff]   ;;  %v2066_v41 = vld [vmem:[#allocation3 + $0xc8] sm:$0xff]   ;;  %s287_s9 = scalar_lea.vmem [#allocation6], %s1714_s23  ;;  %s2152_s20 = sshll.u32 %s2221_s28, 4  ;;  %s2153_s20 = int_to_ptr.vmem [resolvable:$false] %s2152_s20 }
  0x2e   : > { %v1464_v8 = vmax.f32 %v1453_v6, %v2343_v2  ;;  %1840 = vmatprep.subr.bf16.mxu0 %v2047_v15  ;;  %v1718_v33 = vld [vmem:[%s2569_s2] ss:$0 sm:$0xff]  ;;  %v2065_v34 = vld [vmem:[#allocation3 + $0x10] sm:$0xff]   ;;  %v2067_v42 = vld [vmem:[#allocation3 + $0x48] sm:$0xff]   ;;  %s1607_s13 = sshll.u32 %s287_s9, 4  ;;  %s2154_s23 = scalar_lea.vmem %s2153_s20, 512  ;;  %s2514_s13 = int_to_ptr.vmem [resolvable:$true] %s1607_s13 }
  0x2f   : > { %v2068_v43 = vld [vmem:[#allocation3 + $0x88] sm:$0xff]   ;;  %v2070_v53 = vld [vmem:[#allocation3 + $0xc0] sm:$0xff]   ;;  %v2074_v4 = vld [vmem:[#allocation3 + $0x178] sm:$0xff]   ;;  %s2148_s19 = scalar_lea.vmem %s2514_s13, 256  ;;  %p2155_p11 = scmp.lt.s32.totalorder %s2514_s13, %s2153_s20 }
  0x30   : > { %v2361_v9 = vmax.f32 %v1464_v8, %v1462_v7  ;;  %1821 = vmatpush3.bf16.msra.mxu1 %v2052_v20  ;;  %v2069_v48 = vld [vmem:[#allocation3 + $0x8] sm:$0xff]   ;;  %v2071_v54 = vld [vmem:[#allocation3 + $0x40] sm:$0xff]   ;;  %v2075_v6 = vld [vmem:[#allocation3 + $0x1f8] sm:$0xff]   ;;  %p2149_p6 = scmp.ne.s32.totalorder %s2514_s13, %s2148_s19  ;;  %p2156_p12 = scmp.lt.s32.totalorder %s2154_s23, %s2148_s19 }
  0x31   : > { %1841 = vmatpush3.bf16.msra.mxu0 %v2049_v17  ;;  %1822 = vmatprep.subr.bf16.mxu1 %v2054_v22  ;;  %v2072_v55 = vld [vmem:[#allocation3 + $0x80] sm:$0xff]  }
  0x32   : > { %1842 = vmatprep.subr.bf16.mxu0 %v2051_v19  ;;  %v2073_v59 = vld [vmem:[#allocation3] sm:$0xff]   ;;  %p2150_p9 = pnand %p2149_p6, %p2302_p5  ;;  %p2157_p13 = por %p2156_p12, %p2155_p11 }
  0x34   : > { %1823 = vmatpush3.bf16.msra.mxu1 %v2056_v24  ;;  %p2151_p10 = pneg %p2150_p9 }
  0x35   : > { %1843 = vmatpush3.bf16.msra.mxu0 %v2053_v21  ;;  %1824 = vmatprep.subr.bf16.mxu1 %v2058_v26 }
  0x36   : > { %1844 = vmatprep.subr.bf16.mxu0 %v2055_v23  ;;  %p2158_p0 = pnand %p2157_p13, %p2151_p10 }
  0x38   : > { %1825 = vmatpush3.bf16.msra.mxu1 %v2060_v28 }
  0x39   : > { %1845 = vmatpush3.bf16.msra.mxu0 %v2057_v25  ;;  %1826 = vmatprep.subr.bf16.mxu1 %v2062_v30 }
  0x3a   : > { %1846 = vmatprep.subr.bf16.mxu0 %v2059_v27 }
  0x3c   : > { %1827 = vmatpush3.bf16.msra.mxu1 %v2064_v32  ;;  %v1457_v32 = vrot.slane %v2341_v1, 1 }
  0x3d   : > { %1847 = vmatpush3.bf16.msra.mxu0 %v2061_v29  ;;  %1828 = vmatprep.subr.bf16.mxu1 %v2066_v41 }
  0x3e   : > { %1848 = vmatprep.subr.bf16.mxu0 %v2063_v31  ;;  %v1456_v31 = vsel %vm421_vm2, -inf, %v1451_v3 }
  0x40   : > { %1829 = vmatpush3.bf16.msra.mxu1 %v2068_v43 }
  0x41   : > { %1849 = vmatpush3.bf16.msra.mxu0 %v2065_v34  ;;  %1830 = vmatprep.subr.bf16.mxu1 %v2070_v53  ;;  %v1459_v34 = vsel %vm429_vm3, %v1457_v32, %v1458_v5  ;;  %v2083_v32 = vld [vmem:[#allocation3 + $0x1e8] sm:$0xff]  }
  0x42   : > { %1850 = vmatprep.subr.bf16.mxu0 %v2067_v42 }
  0x44   : > { %1831 = vmatpush3.bf16.msra.mxu1 %v2072_v55 }
  0x45   : > { %1851 = vmatpush3.bf16.msra.mxu0 %v2069_v48  ;;  %1860 = vmatprep.subr.bf16.mxu1 %v2074_v4 }
  0x46   : > { %1852 = vmatprep.subr.bf16.mxu0 %v2071_v54 }
  0x49   : > { %1853 = vmatpush3.bf16.msra.mxu0 %v2073_v59 }
  0x4a   : > { %1882 = vmatprep.subr.bf16.mxu0 %v2075_v6 }
  0xec   : > { %v1933_v35 = vpop.f32.mrf.mxu0 }
  0xed   : > { %v2366_v36 = vadd.f32 %v1933_v35, %v1718_v33 }
  0xee   : > { %v393_v37 = vpop.f32.mrf.mxu0 }
  0xef   : > { %v2368_v38 = vadd.f32 %v1718_v33, %v393_v37  ;;  %v448_v39 = vrot.slane %v2366_v36, 3  ;;  %v440_v40 = vrot.slane %v2366_v36, 2  ;;  %v455_v0 = vrot.slane %v2366_v36, 4 }
  0xf0   : > { %v431_v10 = vrot.slane %v2366_v36, 1  ;;  %v406_v14 = vrot.slane %v2366_v36, 5  ;;  %v423_v16 = vrot.slane %v2366_v36, 7  ;;  %v415_v17 = vrot.slane %v2366_v36, 6 }
  0xf1   : > { %v447_v44 = vrot.slane %v2368_v38, 3  ;;  %v439_v45 = vrot.slane %v2368_v38, 2  ;;  %v422_v46 = vrot.slane %v2368_v38, 7  ;;  %v414_v47 = vrot.slane %v2368_v38, 6 }
  0xf2   : > { %v454_v61 = vrot.slane %v2368_v38, 4  ;;  %v405_v8 = vrot.slane %v2368_v38, 5  ;;  %v430_v11 = vrot.slane %v2368_v38, 1  ;;  %v2022_v19 = vpack.i.bf16 %v2368_v38, %v2219_v62 }
  0xf3   : > { %v449_v49 = vsel %vm446_vm4, %v447_v44, %v448_v39  ;;  %v452_v50 = vsel %vm446_vm4, 0.0, %v447_v44  ;;  %v441_v51 = vsel %vm438_vm5, %v439_v45, %v440_v40  ;;  %v444_v52 = vsel %vm438_vm5, 0.0, %v439_v45 }
  0xf4   : > { %v2007_v56 = vpack.i.bf16 %v449_v49, %v452_v50  ;;  %v1997_v57 = vpack.i.bf16 %v441_v51, %v444_v52  ;;  %v427_v58 = vsel %vm421_vm2, 0.0, %v422_v46  ;;  %v419_v60 = vsel %vm413_vm6, 0.0, %v414_v47 }
  0xf5   : > { %v2012_v63 = vpack.i.bf16 %v427_v58, %v2219_v62  ;;  %v2002_v7 = vpack.i.bf16 %v419_v60, %v2219_v62  ;;  %v456_v12 = vsel %vm323_vm0, %v454_v61, %v455_v0  ;;  %v459_v13 = vsel %vm323_vm0, 0.0, %v454_v61 }
  0xf6   : > { %2008 = vrot.lane.b32.xlu1 %v2007_v56, %s2217_s16  ;;  %1998 = vrot.lane.b32.xlu0 %v1997_v57, %s2218_s17  ;;  %v432_v15 = vsel %vm429_vm3, %v430_v11, %v431_v10  ;;  %v2406_v18 = vsel %vm404_vm7, %v405_v8, %v406_v14  ;;  %v2017_v20 = vpack.i.bf16 %v456_v12, %v459_v13  ;;  %v453_v23 = vsel %vm446_vm4, %v448_v39, 0.0  ;;  %v2076_v13 = vld [vmem:[#allocation3 + $0x138] sm:$0xff]  }
  0xf7   : > { %v424_v21 = vsel %vm421_vm2, %v422_v46, %v423_v16  ;;  %v416_v22 = vsel %vm413_vm6, %v414_v47, %v415_v17  ;;  %v445_v24 = vsel %vm438_vm5, %v440_v40, 0.0  ;;  %v460_v27 = vsel %vm323_vm0, %v455_v0, 0.0 }
  0xf8   : > { %v2032_v25 = vpack.i.bf16 %v424_v21, %v453_v23  ;;  %v2027_v26 = vpack.i.bf16 %v416_v22, %v445_v24  ;;  %v2037_v28 = vpack.i.bf16 %v2366_v36, %v460_v27  ;;  %v420_v29 = vsel %vm413_vm6, %v415_v17, 0.0 }
  0xf9   : > { %v428_v30 = vsel %vm421_vm2, %v423_v16, 0.0  ;;  %v1463_v33 = vmax.f32 %v1456_v31, %v2341_v1  ;;  %v411_v44 = vsel %vm404_vm7, 0.0, %v405_v8  ;;  %v436_v1 = vsel %vm429_vm3, 0.0, %v430_v11 }
  0xfa   : > { %2013 = vrot.lane.b32.xlu1 %v2012_v63, %s2217_s16  ;;  %2003 = vrot.lane.b32.xlu0 %v2002_v7, %s2218_s17  ;;  %v437_v23 = vsel %vm429_vm3, %v431_v10, 0.0  ;;  %v2082_v10 = vld [vmem:[#allocation3 + $0x168] sm:$0xff]  }
  0xfb   : > { %v2433_v35 = vmax.f32 %v1463_v33, %v1459_v34  ;;  %v412_v33 = vsel %vm404_vm7, %v406_v14, 0.0 }
  0xfe   : > { %2023 = vrot.lane.b32.xlu1 %v2022_v19, %s2220_s18  ;;  %2018 = vrot.lane.b32.xlu0 %v2017_v20, %s2220_s18  ;;  %v2078_v19 = vld [vmem:[#allocation3 + $0x170] sm:$0xff]  }
  0xff   : > { %v2079_v20 = vld [vmem:[#allocation3 + $0x1f0] sm:$0xff]  }
 0x102   : > { %2033 = vrot.lane.b32.xlu1 %v2032_v25, %s2217_s16  ;;  %2028 = vrot.lane.b32.xlu0 %v2027_v26, %s2218_s17 }
 0x106   : > { %470 = vrot.lane.b32.xlu1 %v420_v29, %s2218_s17  ;;  %2038 = vrot.lane.b32.xlu0 %v2037_v28, %s2220_s18  ;;  %v2080_v28 = vld [vmem:[#allocation3 + $0x130] sm:$0xff]   ;;  %s2519_s17 = scalar_lea.hbm %s2573_s6, %s1812_s14  ;;  %s2521_s18 = scalar_lea.sflag [#allocation5], %s285_s22 }
 0x107   : > { %v2081_v29 = vld [vmem:[#allocation3 + $0x1b0] sm:$0xff]  }
 0x10a   : > { %484 = vrot.lane.b32.xlu0 %v428_v30, %s2217_s16 }
 0x168   : > { %v2009_v37 = vpop.permute.xlu1 %2008  ;;  %v1999_v38 = vpop.permute.xlu0 %1998 }
 0x169   : > { %v2001_v39 = vunpack.i.h.bf16 %v1999_v38  ;;  %v2000_v40 = vunpack.i.l.bf16 %v1999_v38  ;;  %v2011_v45 = vunpack.i.h.bf16 %v2009_v37  ;;  %v2010_v2 = vunpack.i.l.bf16 %v2009_v37 }
 0x16b   : > { %v547_v49 = vsel %vm532_vm8, %v436_v1, %v2000_v40  ;;  %v548_v50 = vsel %vm532_vm8, %v432_v15, %v2001_v39  ;;  %v2077_v15 = vld [vmem:[#allocation3 + $0x1b8] sm:$0xff]   ;;  %v2087_v1 = vld [vmem:[#allocation3 + $0x1e0] sm:$0xff]  }
 0x16c   : > { %v2014_v41 = vpop.permute.xlu1 %2013  ;;  %v2004_v42 = vpop.permute.xlu0 %2003  ;;  %v550_v58 = vsel %vm537_vm9, %v547_v49, %v2010_v2  ;;  %v551_v59 = vsel %vm537_vm9, %v548_v50, %v2011_v45  ;;  %v2091_v49 = vld [vmem:[#allocation3 + $0x1d8] sm:$0xff]  }
 0x16d   : > { %v2006_v43 = vunpack.i.h.bf16 %v2004_v42  ;;  %v2005_v3 = vunpack.i.l.bf16 %v2004_v42  ;;  %v2016_v46 = vunpack.i.h.bf16 %v2014_v41  ;;  %v2015_v5 = vunpack.i.l.bf16 %v2014_v41  ;;  %v2084_v42 = vld [vmem:[#allocation3 + $0x128] sm:$0xff]   ;;  %v2092_v50 = vld [vmem:[#allocation3 + $0x118] sm:$0xff]  }
 0x16f   : > { %v533_v47 = vsel %vm532_vm8, 0.0, %v2005_v3  ;;  %v534_v48 = vsel %vm532_vm8, %v411_v44, %v2006_v43  ;;  %v2085_v43 = vld [vmem:[#allocation3 + $0x1a8] sm:$0xff]   ;;  %v2086_v44 = vld [vmem:[#allocation3 + $0x160] sm:$0xff]  }
 0x170   : > { %v2441_v51 = vpop.permute.xlu1 %2023  ;;  %v2019_v52 = vpop.permute.xlu0 %2018  ;;  %v538_v57 = vsel %vm537_vm9, %v533_v47, %v2015_v5  ;;  %v539_v60 = vsel %vm537_vm9, %v534_v48, %v2016_v46  ;;  %v2088_v5 = vld [vmem:[#allocation3 + $0x120] sm:$0xff]   ;;  %v2090_v48 = vld [vmem:[#allocation3 + $0x158] sm:$0xff]  }
 0x171   : > { %v2026_v53 = vunpack.i.h.bf16 %v2441_v51  ;;  %v2025_v54 = vunpack.i.l.bf16 %v2441_v51  ;;  %v2021_v55 = vunpack.i.h.bf16 %v2019_v52  ;;  %v2020_v56 = vunpack.i.l.bf16 %v2019_v52  ;;  %v2089_v47 = vld [vmem:[#allocation3 + $0x1a0] sm:$0xff]   ;;  %v2093_v51 = vld [vmem:[#allocation3 + $0x198] sm:$0xff]   ;;  %v2094_v52 = vld [vmem:[#allocation3 + $0x150] sm:$0xff]  }
 0x173   : > { %v2452_v61 = vsel %vm542_vm10, %v538_v57, %v2025_v54  ;;  %v553_v62 = vsel %vm542_vm10, %v550_v58, %v2020_v56  ;;  %v554_v63 = vsel %vm542_vm10, %v551_v59, %v2021_v55  ;;  %v2457_v0 = vsel %vm542_vm10, %v539_v60, %v2026_v53  ;;  %v2095_v53 = vld [vmem:[#allocation3 + $0x1d0] sm:$0xff]   ;;  %v2098_v56 = vld [vmem:[#allocation3 + $0x148] sm:$0xff]   ;;  %v2102_v60 = vld [vmem:[#allocation3 + $0x140] sm:$0xff]  }
 0x174   : > { %v2034_v4 = vpop.permute.xlu1 %2033  ;;  %v2029_v6 = vpop.permute.xlu0 %2028  ;;  %v573_v7 = vpack.c.bf16 %v553_v62, %v2452_v61  ;;  %v609_v8 = vpack.c.bf16 %v554_v63, %v553_v62  ;;  %v608_v11 = vpack.c.bf16 %v2457_v0, %v2452_v61  ;;  %v2464_v12 = vpack.c.bf16 %v2452_v61, %v2452_v61  ;;  %v2097_v55 = vld [vmem:[#allocation3 + $0x190] sm:$0xff]   ;;  %v2099_v57 = vld [vmem:[#allocation3 + $0x1c8] sm:$0xff]   ;;  %v2103_v62 = vld [vmem:[#allocation3 + $0x1c0] sm:$0xff]  }
 0x175   : > { %v2031_v16 = vunpack.i.h.bf16 %v2029_v6  ;;  %v2030_v17 = vunpack.i.l.bf16 %v2029_v6  ;;  %v2036_v21 = vunpack.i.h.bf16 %v2034_v4  ;;  %v2035_v22 = vunpack.i.l.bf16 %v2034_v4  ;;  %v2100_v58 = vld [vmem:[#allocation3 + $0x108] sm:$0xff]   ;;  %v2106_v4 = vld [vmem:[#allocation3 + $0x278] sm:$0xff]   ;;  %v306_v6 = vld [vmem:[%s2571_s4] sm:$0xf] }
 0x176   : > { %771 = vmatprep.mubr.bf16.mxu1 %v609_v8  ;;  %908 = vmatprep.mubr.bf16.mxu0 %v573_v7  ;;  %v2101_v59 = vld [vmem:[#allocation3 + $0x188] sm:$0xff]   ;;  %v2107_v7 = vld [vmem:[#allocation3 + $0x238] sm:$0xff]   ;;  %v2108_v8 = vld [vmem:[#allocation3 + $0x270] sm:$0xff]  }
 0x177   : > { %v549_v24 = vsel %vm532_vm8, %v437_v23, %v2030_v17  ;;  %772 = vmatmul.mubr.bf16.vlgmr.msra.gmra.mxu1 %v608_v11  ;;  %909 = vmatmul.mubr.bf16.vlgmr.msra.gmra.mxu0 %v2464_v12  ;;  %v535_v25 = vsel %vm532_vm8, %v2406_v18, %v2031_v16  ;;  %v2109_v11 = vld [vmem:[#allocation3 + $0x230] sm:$0xff]   ;;  %v2112_v16 = vld [vmem:[#allocation3 + $0x260] sm:$0xff]  }
 0x178   : > { %1861 = vmatpush3.bf16.msra.mxu1 %v2076_v13  ;;  %1883 = vmatpush3.bf16.msra.mxu0 %v2077_v15  ;;  %v471_v26 = vpop.permute.xlu1 %470  ;;  %v2039_v27 = vpop.permute.xlu0 %2038  ;;  %v540_v34 = vsel %vm537_vm9, %v535_v25, %v2036_v21  ;;  %v552_v18 = vsel %vm537_vm9, %v549_v24, %v2035_v22  ;;  %v2110_v13 = vld [vmem:[#allocation3 + $0x268] sm:$0xff]   ;;  %v2113_v17 = vld [vmem:[#allocation3 + $0x220] sm:$0xff]   ;;  %v2117_v21 = vld [vmem:[#allocation3 + $0x210] sm:$0xff]  }
 0x179   : > { %v2041_v30 = vunpack.i.h.bf16 %v2039_v27  ;;  %v2040_v31 = vunpack.i.l.bf16 %v2039_v27  ;;  %1862 = vmatprep.subr.bf16.mxu1 %v2078_v19  ;;  %1884 = vmatprep.subr.bf16.mxu0 %v2079_v20  ;;  %v536_v37 = vsel %vm532_vm8, %v412_v33, %v471_v26  ;;  %v2111_v15 = vld [vmem:[#allocation3 + $0x228] sm:$0xff]   ;;  %v2114_v19 = vld [vmem:[#allocation3 + $0x258] sm:$0xff]   ;;  %v2116_v20 = vld [vmem:[#allocation3 + $0x250] sm:$0xff]  }
 0x17a   : > { %v2118_v22 = vld [vmem:[#allocation3 + $0x248] sm:$0xff]   ;;  %v2120_v23 = vld [vmem:[#allocation3 + $0x240] sm:$0xff]  }
 0x17b   : > { %v2480_v38 = vsel %vm542_vm10, %v540_v34, %v2041_v30  ;;  %v555_v39 = vsel %vm542_vm10, %v552_v18, %v2040_v31  ;;  %v2121_v24 = vld [vmem:[#allocation3 + $0x200] sm:$0xff]  }
 0x17c   : > { %1863 = vmatpush3.bf16.msra.mxu1 %v2080_v28  ;;  %1885 = vmatpush3.bf16.msra.mxu0 %v2081_v29  ;;  %v485_v40 = vpop.permute.xlu0 %484  ;;  %v921_v41 = vpack.c.bf16 %v2480_v38, %v2457_v0  ;;  %v922_v36 = vpack.c.bf16 %v555_v39, %v554_v63  ;;  %v1100_v14 = vpack.c.bf16 %v2452_v61, %v555_v39  ;;  %v2104_v63 = vld [vmem:[#allocation3 + $0x100] sm:$0xff]  }
 0x17d   : > { %v541_v3 = vsel %vm537_vm9, %v536_v37, %v485_v40  ;;  %1864 = vmatprep.subr.bf16.mxu1 %v2082_v10  ;;  %1886 = vmatprep.subr.bf16.mxu0 %v2083_v32  ;;  %v2105_v0 = vld [vmem:[#allocation3 + $0x180] sm:$0xff]  }
 0x17e   : > { %v2490_v45 = vsel %vm542_vm10, %v541_v3, %v2025_v54  ;;  %1084 = vmatprep.mubr.bf16.mxu1 %v922_v36  ;;  %1262 = vmatprep.mubr.bf16.mxu0 %v1100_v14  ;;  %v2096_v54 = vld [vmem:[#allocation3 + $0x110] sm:$0xff]  }
 0x17f   : > { %v1099_v2 = vpack.c.bf16 %v2490_v45, %v2480_v38  ;;  %v1277_v46 = vpack.c.bf16 %v2452_v61, %v2490_v45 }
 0x180   : > { %1865 = vmatpush3.bf16.msra.mxu1 %v2084_v42  ;;  %1887 = vmatpush3.bf16.msra.mxu0 %v2085_v43 }
 0x181   : > { %1866 = vmatprep.subr.bf16.mxu1 %v2086_v44  ;;  %1888 = vmatprep.subr.bf16.mxu0 %v2087_v1 }
 0x184   : > { %1867 = vmatpush3.bf16.msra.mxu1 %v2088_v5  ;;  %1889 = vmatpush3.bf16.msra.mxu0 %v2089_v47 }
 0x185   : > { %1868 = vmatprep.subr.bf16.mxu1 %v2090_v48  ;;  %1890 = vmatprep.subr.bf16.mxu0 %v2091_v49 }
 0x188   : > { %1869 = vmatpush3.bf16.msra.mxu1 %v2092_v50  ;;  %1891 = vmatpush3.bf16.msra.mxu0 %v2093_v51 }
 0x189   : > { %1870 = vmatprep.subr.bf16.mxu1 %v2094_v52  ;;  %1892 = vmatprep.subr.bf16.mxu0 %v2095_v53 }
 0x18c   : > { %1871 = vmatpush3.bf16.msra.mxu1 %v2096_v54  ;;  %1893 = vmatpush3.bf16.msra.mxu0 %v2097_v55  ;;  %v1805_v54 = vld [vmem:[%s2572_s5] ss:$0 sm:$0xff] }
 0x18d   : > { %1872 = vmatprep.subr.bf16.mxu1 %v2098_v56  ;;  %1894 = vmatprep.subr.bf16.mxu0 %v2099_v57 }
 0x190   : > { %1873 = vmatpush3.bf16.msra.mxu1 %v2100_v58  ;;  %1895 = vmatpush3.bf16.msra.mxu0 %v2101_v59 }
 0x191   : > { %1874 = vmatprep.subr.bf16.mxu1 %v2102_v60  ;;  %1896 = vmatprep.subr.bf16.mxu0 %v2103_v62 }
 0x194   : > { %1875 = vmatpush3.bf16.msra.mxu1 %v2104_v63  ;;  %1897 = vmatpush3.bf16.msra.mxu0 %v2105_v0 }
 0x195   : > { %1904 = vmatprep.subr.bf16.mxu1 %v2106_v4  ;;  %1934 = vmatprep.subr.msk.mxu0 %vm323_vm0, %v306_v6 }
 0x197   : > { %1085 = vmatmul.mubr.bf16.vlgmr.msra.gmra.mxu1 %v921_v41  ;;  %1263 = vmatmul.mubr.bf16.vlgmr.msra.gmra.mxu0 %v1099_v2 }
 0x198   : > { %1905 = vmatpush3.bf16.msra.mxu1 %v2107_v7  ;;  %1440 = vmatprep.mubr.bf16.mxu1 %v2464_v12  ;;  %v2115_v12 = vld [vmem:[#allocation3 + $0x218] sm:$0xff]  }
 0x199   : > { %1906 = vmatprep.subr.bf16.mxu1 %v2108_v8  ;;  %1935 = vmatpush3.msk.msra.mxu0 %vm323_vm0, %v306_v6 }
 0x19a   : > { %1936 = vmatprep.mubr.msk.f32.mxu0 %vm316_vm1, %v2433_v35  ;;  %v2119_v35 = vld [vmem:[#allocation3 + $0x208] sm:$0xff]  }
 0x19c   : > { %1907 = vmatpush3.bf16.msra.mxu1 %v2109_v11 }
 0x19d   : > { %1908 = vmatprep.subr.bf16.mxu1 %v2110_v13 }
 0x19f   : > { %1937 = vmatmul.mubr.msk.f32.vlgmr.msra.gmra.mxu0 %vm316_vm1, %v2361_v9 }
 0x1a0   : > { %1909 = vmatpush3.bf16.msra.mxu1 %v2111_v15 }
 0x1a1   : > { %1910 = vmatprep.subr.bf16.mxu1 %v2112_v16 }
 0x1a4   : > { %1911 = vmatpush3.bf16.msra.mxu1 %v2113_v17 }
 0x1a5   : > { %1912 = vmatprep.subr.bf16.mxu1 %v2114_v19 }
 0x1a8   : > { %1913 = vmatpush3.bf16.msra.mxu1 %v2115_v12 }
 0x1a9   : > { %1914 = vmatprep.subr.bf16.mxu1 %v2116_v20 }
 0x1ac   : > { %1915 = vmatpush3.bf16.msra.mxu1 %v2117_v21 }
 0x1ad   : > { %1916 = vmatprep.subr.bf16.mxu1 %v2118_v22 }
 0x1b0   : > { %1917 = vmatpush3.bf16.msra.mxu1 %v2119_v35 }
 0x1b1   : > { %1918 = vmatprep.subr.bf16.mxu1 %v2120_v23 }
 0x1b4   : > { %1919 = vmatpush3.bf16.msra.mxu1 %v2121_v24 }
 0x1b7   : > { %1441 = vmatmul.mubr.bf16.vlgmr.msra.gmra.mxu1 %v1277_v46 }
 0x237   : > { %v1832_v9 = vpop.f32.mrf.mxu1  ;;  %v1854_v25 = vpop.f32.mrf.mxu0 }
 0x239   : > { %v1833_v26 = vpop.f32.mrf.mxu1  ;;  %v1855_v27 = vpop.f32.mrf.mxu0 }
 0x23a   : > { %v1834_v37 = vadd.f32 %v1833_v26, %v1832_v9  ;;  %v1856_v38 = vadd.f32 %v1855_v27, %v1854_v25 }
 0x23b   : > { %v1835_v28 = vpop.f32.mrf.mxu1  ;;  %v1857_v29 = vpop.f32.mrf.mxu0 }
 0x23c   : > { %v911_v41 = vadd.f32 %v1856_v38, %v1834_v37 }
 0x23d   : > { %v1836_v30 = vpop.f32.mrf.mxu1  ;;  %v1858_v31 = vpop.f32.mrf.mxu0 }
 0x23e   : > { %v1837_v36 = vadd.f32 %v1836_v30, %v1835_v28  ;;  %v1859_v14 = vadd.f32 %v1858_v31, %v1857_v29 }
 0x240   : > { %v914_v45 = vadd.f32 %v1859_v14, %v1837_v36 }
 0x257   : > { %v1876_v10 = vpop.f32.mrf.mxu1  ;;  %v1898_v32 = vpop.f32.mrf.mxu0 }
 0x259   : > { %v1877_v33 = vpop.f32.mrf.mxu1  ;;  %v1899_v34 = vpop.f32.mrf.mxu0 }
 0x25a   : > { %v1878_v40 = vadd.f32 %v1877_v33, %v1876_v10  ;;  %v1900_v2 = vadd.f32 %v1899_v34, %v1898_v32 }
 0x25b   : > { %v1879_v18 = vpop.f32.mrf.mxu1  ;;  %v1901_v39 = vpop.f32.mrf.mxu0 }
 0x25c   : > { %v1093_v43 = vadd.f32 %v1878_v40, %v911_v41 }
 0x25d   : > { %v1880_v61 = vpop.f32.mrf.mxu1  ;;  %v1902_v42 = vpop.f32.mrf.mxu0 }
 0x25e   : > { %v1881_v3 = vadd.f32 %v1880_v61, %v1879_v18  ;;  %v1271_v5 = vadd.f32 %v1900_v2, %v1093_v43  ;;  %v1903_v51 = vadd.f32 %v1902_v42, %v1901_v39 }
 0x25f   : > { %v1938_v1 = vpop.f32.mrf.mxu0 }
 0x260   : > { %v1094_v47 = vadd.f32 %v1881_v3, %v914_v45 }
 0x261   : > { %v1542_v50 = vpop.f32.mrf.mxu0 }
 0x262   : > { %v1272_v55 = vadd.f32 %v1903_v51, %v1094_v47 }
 0x277   : > { %v1920_v44 = vpop.f32.mrf.mxu1 }
 0x279   : > { %v1921_v46 = vpop.f32.mrf.mxu1 }
 0x27a   : > { %v1922_v48 = vadd.f32 %v1921_v46, %v1920_v44 }
 0x27b   : > { %v1923_v49 = vpop.f32.mrf.mxu1 }
 0x27c   : > { %v1449_v52 = vadd.f32 %v1922_v48, %v1271_v5 }
 0x27d   : > { %v1924_v53 = vpop.f32.mrf.mxu1 }
 0x27e   : > { %v1925_v56 = vadd.f32 %v1924_v53, %v1923_v49  ;;  %v1551_v57 = vadd.f32 %v1542_v50, %v1449_v52 }
 0x280   : > { %v1450_v58 = vadd.f32 %v1925_v56, %v1272_v55  ;;  %v1559_v59 = vadd.f32 %v1805_v54, %v1551_v57 }
 0x282   : > { %v1552_v60 = vadd.f32 %v1938_v1, %v1450_v58  ;;  %1561 = vst [vmem:[%s287_s9] sm:$0xff] %v1559_v59 }
 0x284   : > { %v1560_v62 = vadd.f32 %v1805_v54, %v1552_v60 }
 0x286   : > { %1562 = vst [vmem:[%s287_s9 + $0x8] sm:$0xff] %v1560_v62  ;;  %v1563_v63 = vadd.f32 %v1560_v62, %v1559_v59 }
 0x287   : > { %2161 = shalt.err (!%p2158_p0)
}
 0x288   : > { %s2162_s22 = scalar_lea.hbm %s2519_s17, 256  ;;  %s2166_s9 = scalar_lea.hbm %s2573_s6, 512 }
 0x289   : > { %p2163_p1 = scmp.ne.s32.totalorder %s2519_s17, %s2162_s22  ;;  %p2167_p4 = scmp.lt.s32.totalorder %s2519_s17, %s2573_s6 }
 0x28a   : > { %p2168_p7 = scmp.lt.s32.totalorder %s2166_s9, %s2162_s22 }
 0x28b   : > { %p2164_p2 = pnand %p2163_p1, %p2302_p5 }
 0x28c   : > { %p2169_p8 = por %p2168_p7, %p2167_p4 }
 0x28d   : > { %p2165_p3 = pneg %p2164_p2 }
 0x28f   : > { %p2170_p6 = pnand %p2169_p8, %p2165_p3 }
 0x291   : > { %2173 = shalt.err (!%p2170_p6)
}
 0x292   : > { %s2222_s16 = smov 128   ;;  %s2223_s19 = smov 8   ;;  %v1564_v0 = vrot.slane %v1563_v63, 4 }
 0x293   : > { %1943 = dma.vmem_to_hbm [thread:$0]  (%p2302_p5), %s2514_s13, 256, %s2519_s17, %s2521_s18, %s2222_s16, %s2222_s16, %s2223_s19  }
 0x294   : > { %v1565_v4 = vadd.f32 %v1564_v0, %v1563_v63  ;;  %s1717_s28 = sshll.u32 %s2332_s21, 2 }
 0x295   : > { %s302_s17 = scalar_lea.vmem %s2574_s7, %s1717_s28 }
 0x296   : > { %v1566_v6 = vrot.slane %v1565_v4, 2 }
 0x298   : > { %v1567_v7 = vadd.f32 %v1566_v6, %v1565_v4 }
 0x29a   : > { %v1568_v8 = vrot.slane %v1567_v7, 1 }
 0x29c   : > { %v1569_v11 = vadd.f32 %v1568_v8, %v1567_v7 }
 0x29e   : > { %v1570_v13 = vmul.f32 0.0625, %v1569_v11 }
 0x2a0   : > { %v1571_v15 = vsub.f32 %v1559_v59, %v1570_v13  ;;  %v1572_v16 = vsub.f32 %v1560_v62, %v1570_v13  ;;  %v1574_v23 = vmul.f32 %v1570_v13, %v1570_v13 }
 0x2a2   : > { %v1576_v17 = vmul.f32 %v1571_v15, %v1571_v15  ;;  %v1577_v19 = vmul.f32 %v1572_v16, %v1572_v16  ;;  %v1586_v25 = vsel %vm421_vm2, %v1570_v13, %v1574_v23 }
 0x2a4   : > { %v1578_v12 = vadd.f32 %v1577_v19, %v1576_v17 }
 0x2a6   : > { %v1579_v20 = vrot.slane %v1578_v12, 4 }
 0x2a8   : > { %v1580_v21 = vadd.f32 %v1579_v20, %v1578_v12 }
 0x2aa   : > { %v1581_v22 = vrot.slane %v1580_v21, 2 }
 0x2ac   : > { %v1582_v35 = vadd.f32 %v1581_v22, %v1580_v21 }
 0x2ae   : > { %v1583_v24 = vrot.slane %v1582_v35, 1 }
 0x2b0   : > { %v1584_v9 = vadd.f32 %v1583_v24, %v1582_v35 }
 0x2b2   : > { %v1587_v26 = vsel %vm413_vm6, %v1586_v25, %v1584_v9 }
 0x2b3   : > { %1588 = vst [vmem:[%s302_s17] sm:$0x7] %v1587_v26 }
 0x2b4 PF: > { %p1955_p5 = scmp.ge.s32.totalorder %s2212_s27, 2  ;;  %s1625_s18 = sand.u32 1, %s2200_s24  }
 0x2b5   : > { %p2578_p9 = scmp.ne.s32.totalorder %s2576_s12, 0  ;;  %s1626_s21 = scalar_lea.sflag [#allocation5], %s1625_s18 }
 0x2b7   : > { %p1950_p10 = pnand %p1955_p5, %p2578_p9 }
 0x2b9   : > { %p1951_p11 = pneg %p1950_p10 }
 0x2bb   : > { %2195 = dma.done.wait (%p1951_p11), %s1626_s21, 256  }
 0x2bc   : > { %2197 = vsyncadd (%p1951_p11), %s1626_s21, 4294967040  ;;  %p19_p12 = scmp.ge.s32.totalorder %s2289_s30, 4   ;;  %s2579_s24 = smov %s2204_s25 }
 0x2bd   : > { %s2580_s25 = smov %s2208_s26  ;;  %s2581_s26 = smov %s2300_s10 }
 0x2be   : > { %s2582_s27 = smov %s2289_s30  ;;  %21 = sbr.rel (!%p19_p12) target bundleno = 4 (0x4), region = 100 }
 0x2c3   :  { %1638 = vsyncpa [#allocation4], 1 }
 0x2c4   :  { %1640 = vsyncpa [#allocation4 + $0x1], 1 }
 0x2c5   :  { %1641 = vsyncpa [#allocation5], 1 }
 0x2c6   :  { %1643 = vsyncpa [#allocation5 + $0x1], 1 }

</bundles_post_ra>
